<compile_context>
chip_gen: v7x
topology: tpu7x:2x2x1
jax: 0.10.0
libtpu: 0.0.40
codegen_flags: <defaults>
</compile_context>

<pallas_src>
import functools

import jax
import jax.numpy as jnp
from jax.experimental import pallas as pl
from jax.experimental.pallas import tpu as pltpu

EPS = 1e-5


@functools.partial(jax.jit, static_argnames=("padding", "compute_dtype"))
def conv_block(x, w_real, w_imag, gamma, beta, *, padding=1, compute_dtype=jnp.bfloat16):
    """ConvBlock forward. x: [B, 2*Cin, H, W] (real ++ imag channels), stride 1."""
    B, C2in, H, W = x.shape
    Cout, _, K, _ = w_real.shape
    C2out = 2 * Cout
    p = padding
    Hp, Wp = H + 2 * p, W + 2 * p
    Ho, Wo = Hp - K + 1, Wp - K + 1          # output spatial dims (stride 1)
    S = Ho * Wp                              # embedded output row length (spatial on lanes)
    Sin = Hp * Wp + (K - 1)                  # flat padded input + tail so every tap window is in-bounds
    KC = K * K * C2in                        # matmul contraction depth (72 here)
    n_valid = B * Ho * Wo                    # number of real (non-embedded-garbage) positions
    inv_n = 1.0 / float(n_valid)

    # Combined real weight implementing the complex product, flattened tap-major so that
    # w_flat[o, (kh*K + kw)*C2in + c] matches the stacked-RHS row order: [2Cout, K*K*2Cin].
    w_top = jnp.concatenate([w_real, -w_imag], axis=1)          # [Cout, 2Cin, K, K]
    w_bot = jnp.concatenate([w_imag,  w_real], axis=1)          # [Cout, 2Cin, K, K]
    w_comb = jnp.concatenate([w_top, w_bot], axis=0)            # [2Cout, 2Cin, K, K]
    w_flat = (w_comb.transpose(0, 2, 3, 1)                      # [2Cout, K, K, 2Cin]
              .reshape(C2out, KC)
              .astype(compute_dtype))

    # Channel-major, flat-spatial padded input (no NHWC transpose, no im2col in HBM).
    xp = jnp.pad(x, ((0, 0), (0, 0), (p, p), (p, p)))           # [B, 2Cin, Hp, Wp]
    xf = xp.reshape(B, C2in, Hp * Wp)
    xf = jnp.pad(xf, ((0, 0), (0, 0), (0, K - 1))).astype(compute_dtype)   # [B, 2Cin, Sin]

    # 1.0 where the embedded column is a real output position (w < Wo), else 0.0.
    col = jnp.arange(S, dtype=jnp.int32)
    mask = ((col % Wp) < Wo).astype(jnp.float32)[None, :]       # [1, S]

    gamma2 = gamma.astype(jnp.float32).reshape(C2out, 1)
    beta2 = beta.astype(jnp.float32).reshape(C2out, 1)

    # ------------- Fused kernel: conv (1 matmul / image) + BN stats + normalize + ReLU -------------
    def fused_kernel(x_ref, w_ref, m_ref, g_ref, bta_ref, o_ref, rhs_ref):
        m = m_ref[...]                                            # [1, S] valid-column mask

        # Pass A: conv.  Stack the K*K shifted windows once into the VMEM scratch RHS and do a
        # single contraction-KC matmul per image; write pre-BN y into the resident output block.
        ssum = jnp.zeros((C2out, 1), jnp.float32)
        for b in range(B):                                        # static unroll, small B
            for kh in range(K):
                for kw in range(K):
                    t = kh * K + kw
                    off = kh * Wp + kw                            # static element offset
                    rhs_ref[pl.ds(t * C2in, C2in), :] = x_ref[b, :, pl.ds(off, S)]
            acc = jnp.dot(w_ref[...], rhs_ref[...],
                          preferred_element_type=jnp.float32)     # [2Cout, S], f32 acc
            o_ref[b] = acc
            ssum = ssum + jnp.sum(acc * m, axis=1, keepdims=True)

        mean = ssum * inv_n                                       # [2Cout, 1]

        # Pass B (VMEM-resident): centered variance (no E[x^2]-E[x]^2 cancellation).
        ssq = jnp.zeros((C2out, 1), jnp.float32)
        for b in range(B):
            d = (o_ref[b] - mean) * m
            ssq = ssq + jnp.sum(d * d, axis=1, keepdims=True)
        var = ssq * inv_n                                         # biased variance

        scale = jax.lax.rsqrt(var + EPS) * g_ref[...]             # computed once
        shift = bta_ref[...] - mean * scale

        # Pass C: normalize + affine + ReLU, in place on the resident output block.
        for b in range(B):
            o_ref[b] = jnp.maximum(o_ref[b] * scale + shift, 0.0)

    flops = 2 * B * C2out * S * KC
    bytes_accessed = (xf.size * xf.dtype.itemsize
                      + w_flat.size * w_flat.dtype.itemsize
                      + mask.size * 4
                      + 2 * C2out * 4
                      + B * C2out * S * 4)

    out_emb = pl.pallas_call(
        fused_kernel,
        out_shape=jax.ShapeDtypeStruct((B, C2out, S), jnp.float32),   # embedded output
        grid=(1,),
        in_specs=[
            pl.BlockSpec((B, C2in, Sin), lambda i: (0, 0, 0)),        # padded flat input
            pl.BlockSpec((C2out, KC), lambda i: (0, 0)),              # flattened weights
            pl.BlockSpec((1, S), lambda i: (0, 0)),                   # valid-column mask
            pl.BlockSpec((C2out, 1), lambda i: (0, 0)),               # gamma
            pl.BlockSpec((C2out, 1), lambda i: (0, 0)),               # beta
        ],
        out_specs=pl.BlockSpec((B, C2out, S), lambda i: (0, 0, 0)),
        scratch_shapes=[pltpu.VMEM((KC, S), compute_dtype)],          # stacked RHS buffer
        compiler_params=pltpu.CompilerParams(
            dimension_semantics=("arbitrary",),
            vmem_limit_bytes=32 * 1024 * 1024,                        # fits v5e/v6e/v7x budgets
        ),
        cost_estimate=pl.CostEstimate(flops=flops, transcendentals=0,
                                      bytes_accessed=bytes_accessed),
    )(xf, w_flat, mask, gamma2, beta2)

    # De-embed: [B, 2Cout, Ho, Wp] -> drop the Wp tail columns -> NCHW output, no transpose.
    # Wo < 128 here, so per-row in-kernel stores would all be masked partials; the wrapper
    # slice over the tiny output is the cheaper option at this shape.
    return out_emb.reshape(B, C2out, Ho, Wp)[:, :, :, :Wo]


def ref_forward(x, w_real, w_imag, gamma, beta, *, padding=1):
    """Pure-JAX reference (for correctness check only)."""
    Cin = x.shape[1] // 2
    xr, xi = x[:, :Cin], x[:, Cin:]
    conv = lambda a, w: jax.lax.conv_general_dilated(
        a, w, (1, 1), ((padding, padding), (padding, padding)),
        dimension_numbers=("NCHW", "OIHW", "NCHW"))
    yr = conv(xr, w_real) - conv(xi, w_imag)
    yi = conv(xr, w_imag) + conv(xi, w_real)
    y = jnp.concatenate([yr, yi], axis=1)
    mean = y.mean(axis=(0, 2, 3), keepdims=True)
    var = ((y - mean) ** 2).mean(axis=(0, 2, 3), keepdims=True)
    yn = (y - mean) / jnp.sqrt(var + EPS) * gamma[None, :, None, None] + beta[None, :, None, None]
    return jnp.maximum(yn, 0.0)


if __name__ == "__main__":
    # ConvBlock(in_channels=4, out_channels=8, kernel_size=3, padding=1), norm=True -> no conv bias.
    B, Cin, Cout, H, W, K = 2, 4, 8, 16, 16, 3

    key = jax.random.PRNGKey(0)
    kx, kwr, kwi = jax.random.split(key, 3)

    x = jax.random.normal(kx, (B, 2 * Cin, H, W), dtype=jnp.float32)
    fan_in = Cin * K * K
    w_real = jax.random.normal(kwr, (Cout, Cin, K, K), dtype=jnp.float32) / jnp.sqrt(fan_in)
    w_imag = jax.random.normal(kwi, (Cout, Cin, K, K), dtype=jnp.float32) / jnp.sqrt(fan_in)
    gamma = jnp.ones((2 * Cout,), dtype=jnp.float32)    # BN weight default
    beta = jnp.zeros((2 * Cout,), dtype=jnp.float32)    # BN bias default

    out = jax.block_until_ready(conv_block(x, w_real, w_imag, gamma, beta, padding=1))
    assert out.shape == (B, 2 * Cout, H, W), out.shape

    # The kernel computes the conv in bf16 (f32 accumulation), so compare against the
    # reference evaluated on bf16-rounded operands.
    xq = x.astype(jnp.bfloat16).astype(jnp.float32)
    wrq = w_real.astype(jnp.bfloat16).astype(jnp.float32)
    wiq = w_imag.astype(jnp.bfloat16).astype(jnp.float32)
    ref = jax.block_until_ready(ref_forward(xq, wrq, wiq, gamma, beta, padding=1))

    err = float(jnp.max(jnp.abs(out - ref)))
    assert jnp.allclose(out, ref, rtol=1e-3, atol=1e-3), err

    print("KERNEL_OK")
</pallas_src>

<mosaic_0001>
module attributes {stable_mosaic.version = 11 : i64} {
  func.func @fused_kernel(%arg0: i32, %arg1: memref<2x8x326xbf16, #tpu.memory_space<vmem>>, %arg2: memref<16x72xbf16, #tpu.memory_space<vmem>>, %arg3: memref<1x288xf32, #tpu.memory_space<vmem>>, %arg4: memref<16x1xf32, #tpu.memory_space<vmem>>, %arg5: memref<16x1xf32, #tpu.memory_space<vmem>>, %arg6: memref<2x16x288xf32, #tpu.memory_space<vmem>>, %arg7: memref<72x288xbf16, #tpu.memory_space<vmem>>) attributes {dimension_semantics = [#tpu.dimension_semantics<arbitrary>], iteration_bounds = array<i64: 1>, scalar_prefetch = 0 : i64, scratch_operands = 1 : i64, tpu.core_type = #tpu.core_type<tc>, window_params = [{pipeline_mode = #tpu.pipeline_mode<synchronous>, transform_indices = @transform_0, window_bounds = array<i64: 2, 8, 326>}, {pipeline_mode = #tpu.pipeline_mode<synchronous>, transform_indices = @transform_1, window_bounds = array<i64: 16, 72>}, {pipeline_mode = #tpu.pipeline_mode<synchronous>, transform_indices = @transform_2, window_bounds = array<i64: 1, 288>}, {pipeline_mode = #tpu.pipeline_mode<synchronous>, transform_indices = @transform_3, window_bounds = array<i64: 16, 1>}, {pipeline_mode = #tpu.pipeline_mode<synchronous>, transform_indices = @transform_4, window_bounds = array<i64: 16, 1>}, {pipeline_mode = #tpu.pipeline_mode<synchronous>, transform_indices = @transform_5, window_bounds = array<i64: 2, 16, 288>}]} {
    %c0 = arith.constant 0 : index
    %c0_0 = arith.constant 0 : index
    %0 = vector.load %arg3[%c0, %c0_0] : memref<1x288xf32, #tpu.memory_space<vmem>>, vector<1x288xf32>
    %cst = arith.constant 0.000000e+00 : f32
    %1 = vector.broadcast %cst : f32 to vector<16x1xf32>
    %c0_1 = arith.constant 0 : index
    %c0_2 = arith.constant 0 : index
    %c0_3 = arith.constant 0 : index
    %2 = vector.load %arg1[%c0_1, %c0_2, %c0_3] : memref<2x8x326xbf16, #tpu.memory_space<vmem>>, vector<1x8x288xbf16>
    %3 = vector.shape_cast %2 : vector<1x8x288xbf16> to vector<8x288xbf16>
    %c0_4 = arith.constant 0 : index
    %c0_5 = arith.constant 0 : index
    %4 = vector.load %arg7[%c0_4, %c0_5] : memref<72x288xbf16, #tpu.memory_space<vmem>>, vector<8x288xbf16>
    tpu.vector_store %arg7[%c0_4, %c0_5], %3 {strides = array<i32>} : memref<72x288xbf16, #tpu.memory_space<vmem>>, vector<8x288xbf16>,
    %c0_6 = arith.constant 0 : index
    %c0_7 = arith.constant 0 : index
    %c1 = arith.constant 1 : index
    %5 = vector.load %arg1[%c0_6, %c0_7, %c1] : memref<2x8x326xbf16, #tpu.memory_space<vmem>>, vector<1x8x288xbf16>
    %6 = vector.shape_cast %5 : vector<1x8x288xbf16> to vector<8x288xbf16>
    %c8 = arith.constant 8 : index
    %c0_8 = arith.constant 0 : index
    %7 = vector.load %arg7[%c8, %c0_8] : memref<72x288xbf16, #tpu.memory_space<vmem>>, vector<8x288xbf16>
    tpu.vector_store %arg7[%c8, %c0_8], %6 {strides = array<i32>} : memref<72x288xbf16, #tpu.memory_space<vmem>>, vector<8x288xbf16>,
    %c0_9 = arith.constant 0 : index
    %c0_10 = arith.constant 0 : index
    %c2 = arith.constant 2 : index
    %8 = vector.load %arg1[%c0_9, %c0_10, %c2] : memref<2x8x326xbf16, #tpu.memory_space<vmem>>, vector<1x8x288xbf16>
    %9 = vector.shape_cast %8 : vector<1x8x288xbf16> to vector<8x288xbf16>
    %c16 = arith.constant 16 : index
    %c0_11 = arith.constant 0 : index
    %10 = vector.load %arg7[%c16, %c0_11] : memref<72x288xbf16, #tpu.memory_space<vmem>>, vector<8x288xbf16>
    tpu.vector_store %arg7[%c16, %c0_11], %9 {strides = array<i32>} : memref<72x288xbf16, #tpu.memory_space<vmem>>, vector<8x288xbf16>,
    %c0_12 = arith.constant 0 : index
    %c0_13 = arith.constant 0 : index
    %c18 = arith.constant 18 : index
    %11 = vector.load %arg1[%c0_12, %c0_13, %c18] : memref<2x8x326xbf16, #tpu.memory_space<vmem>>, vector<1x8x288xbf16>
    %12 = vector.shape_cast %11 : vector<1x8x288xbf16> to vector<8x288xbf16>
    %c24 = arith.constant 24 : index
    %c0_14 = arith.constant 0 : index
    %13 = vector.load %arg7[%c24, %c0_14] : memref<72x288xbf16, #tpu.memory_space<vmem>>, vector<8x288xbf16>
    tpu.vector_store %arg7[%c24, %c0_14], %12 {strides = array<i32>} : memref<72x288xbf16, #tpu.memory_space<vmem>>, vector<8x288xbf16>,
    %c0_15 = arith.constant 0 : index
    %c0_16 = arith.constant 0 : index
    %c19 = arith.constant 19 : index
    %14 = vector.load %arg1[%c0_15, %c0_16, %c19] : memref<2x8x326xbf16, #tpu.memory_space<vmem>>, vector<1x8x288xbf16>
    %15 = vector.shape_cast %14 : vector<1x8x288xbf16> to vector<8x288xbf16>
    %c32 = arith.constant 32 : index
    %c0_17 = arith.constant 0 : index
    %16 = vector.load %arg7[%c32, %c0_17] : memref<72x288xbf16, #tpu.memory_space<vmem>>, vector<8x288xbf16>
    tpu.vector_store %arg7[%c32, %c0_17], %15 {strides = array<i32>} : memref<72x288xbf16, #tpu.memory_space<vmem>>, vector<8x288xbf16>,
    %c0_18 = arith.constant 0 : index
    %c0_19 = arith.constant 0 : index
    %c20 = arith.constant 20 : index
    %17 = vector.load %arg1[%c0_18, %c0_19, %c20] : memref<2x8x326xbf16, #tpu.memory_space<vmem>>, vector<1x8x288xbf16>
    %18 = vector.shape_cast %17 : vector<1x8x288xbf16> to vector<8x288xbf16>
    %c40 = arith.constant 40 : index
    %c0_20 = arith.constant 0 : index
    %19 = vector.load %arg7[%c40, %c0_20] : memref<72x288xbf16, #tpu.memory_space<vmem>>, vector<8x288xbf16>
    tpu.vector_store %arg7[%c40, %c0_20], %18 {strides = array<i32>} : memref<72x288xbf16, #tpu.memory_space<vmem>>, vector<8x288xbf16>,
    %c0_21 = arith.constant 0 : index
    %c0_22 = arith.constant 0 : index
    %c36 = arith.constant 36 : index
    %20 = vector.load %arg1[%c0_21, %c0_22, %c36] : memref<2x8x326xbf16, #tpu.memory_space<vmem>>, vector<1x8x288xbf16>
    %21 = vector.shape_cast %20 : vector<1x8x288xbf16> to vector<8x288xbf16>
    %c48 = arith.constant 48 : index
    %c0_23 = arith.constant 0 : index
    %22 = vector.load %arg7[%c48, %c0_23] : memref<72x288xbf16, #tpu.memory_space<vmem>>, vector<8x288xbf16>
    tpu.vector_store %arg7[%c48, %c0_23], %21 {strides = array<i32>} : memref<72x288xbf16, #tpu.memory_space<vmem>>, vector<8x288xbf16>,
    %c0_24 = arith.constant 0 : index
    %c0_25 = arith.constant 0 : index
    %c37 = arith.constant 37 : index
    %23 = vector.load %arg1[%c0_24, %c0_25, %c37] : memref<2x8x326xbf16, #tpu.memory_space<vmem>>, vector<1x8x288xbf16>
    %24 = vector.shape_cast %23 : vector<1x8x288xbf16> to vector<8x288xbf16>
    %c56 = arith.constant 56 : index
    %c0_26 = arith.constant 0 : index
    %25 = vector.load %arg7[%c56, %c0_26] : memref<72x288xbf16, #tpu.memory_space<vmem>>, vector<8x288xbf16>
    tpu.vector_store %arg7[%c56, %c0_26], %24 {strides = array<i32>} : memref<72x288xbf16, #tpu.memory_space<vmem>>, vector<8x288xbf16>,
    %c0_27 = arith.constant 0 : index
    %c0_28 = arith.constant 0 : index
    %c38 = arith.constant 38 : index
    %26 = vector.load %arg1[%c0_27, %c0_28, %c38] : memref<2x8x326xbf16, #tpu.memory_space<vmem>>, vector<1x8x288xbf16>
    %27 = vector.shape_cast %26 : vector<1x8x288xbf16> to vector<8x288xbf16>
    %c64 = arith.constant 64 : index
    %c0_29 = arith.constant 0 : index
    %28 = vector.load %arg7[%c64, %c0_29] : memref<72x288xbf16, #tpu.memory_space<vmem>>, vector<8x288xbf16>
    tpu.vector_store %arg7[%c64, %c0_29], %27 {strides = array<i32>} : memref<72x288xbf16, #tpu.memory_space<vmem>>, vector<8x288xbf16>,
    %c0_30 = arith.constant 0 : index
    %c0_31 = arith.constant 0 : index
    %29 = vector.load %arg2[%c0_30, %c0_31] : memref<16x72xbf16, #tpu.memory_space<vmem>>, vector<16x72xbf16>
    %c0_32 = arith.constant 0 : index
    %c0_33 = arith.constant 0 : index
    %30 = vector.load %arg7[%c0_32, %c0_33] : memref<72x288xbf16, #tpu.memory_space<vmem>>, vector<72x288xbf16>
    %cst_34 = arith.constant dense<0.000000e+00> : vector<16x288xf32>
    %31 = tpu.matmul %29, %30, %cst_34 {dimension_numbers = #tpu.dot_dimension_numbers<[1], [0], [0], [1], [0, 0, 1, 1], [], []>} : vector<16x72xbf16>, vector<72x288xbf16>, vector<16x288xf32> -> vector<16x288xf32>
    %c0_35 = arith.constant 0 : index
    %c0_36 = arith.constant 0 : index
    %c0_37 = arith.constant 0 : index
    %32 = vector.load %arg6[%c0_35, %c0_36, %c0_37] : memref<2x16x288xf32, #tpu.memory_space<vmem>>, vector<1x16x288xf32>
    %33 = vector.shape_cast %32 : vector<1x16x288xf32> to vector<16x288xf32>
    %34 = vector.shape_cast %31 : vector<16x288xf32> to vector<1x16x288xf32>
    tpu.vector_store %arg6[%c0_35, %c0_36, %c0_37], %34 {strides = array<i32>} : memref<2x16x288xf32, #tpu.memory_space<vmem>>, vector<1x16x288xf32>,
    %35 = vector.broadcast %0 : vector<1x288xf32> to vector<16x288xf32>
    %36 = arith.mulf %31, %35 : vector<16x288xf32>
    %cst_38 = arith.constant dense<0.000000e+00> : vector<16xf32>
    %37 = vector.multi_reduction <add>, %36, %cst_38 [1] : vector<16x288xf32> to vector<16xf32>
    %38 = vector.shape_cast %37 : vector<16xf32> to vector<16x1xf32>
    %39 = arith.addf %1, %38 : vector<16x1xf32>
    %c1_39 = arith.constant 1 : index
    %c0_40 = arith.constant 0 : index
    %c0_41 = arith.constant 0 : index
    %40 = vector.load %arg1[%c1_39, %c0_40, %c0_41] : memref<2x8x326xbf16, #tpu.memory_space<vmem>>, vector<1x8x288xbf16>
    %41 = vector.shape_cast %40 : vector<1x8x288xbf16> to vector<8x288xbf16>
    %c0_42 = arith.constant 0 : index
    %c0_43 = arith.constant 0 : index
    %42 = vector.load %arg7[%c0_42, %c0_43] : memref<72x288xbf16, #tpu.memory_space<vmem>>, vector<8x288xbf16>
    tpu.vector_store %arg7[%c0_42, %c0_43], %41 {strides = array<i32>} : memref<72x288xbf16, #tpu.memory_space<vmem>>, vector<8x288xbf16>,
    %c1_44 = arith.constant 1 : index
    %c0_45 = arith.constant 0 : index
    %c1_46 = arith.constant 1 : index
    %43 = vector.load %arg1[%c1_44, %c0_45, %c1_46] : memref<2x8x326xbf16, #tpu.memory_space<vmem>>, vector<1x8x288xbf16>
    %44 = vector.shape_cast %43 : vector<1x8x288xbf16> to vector<8x288xbf16>
    %c8_47 = arith.constant 8 : index
    %c0_48 = arith.constant 0 : index
    %45 = vector.load %arg7[%c8_47, %c0_48] : memref<72x288xbf16, #tpu.memory_space<vmem>>, vector<8x288xbf16>
    tpu.vector_store %arg7[%c8_47, %c0_48], %44 {strides = array<i32>} : memref<72x288xbf16, #tpu.memory_space<vmem>>, vector<8x288xbf16>,
    %c1_49 = arith.constant 1 : index
    %c0_50 = arith.constant 0 : index
    %c2_51 = arith.constant 2 : index
    %46 = vector.load %arg1[%c1_49, %c0_50, %c2_51] : memref<2x8x326xbf16, #tpu.memory_space<vmem>>, vector<1x8x288xbf16>
    %47 = vector.shape_cast %46 : vector<1x8x288xbf16> to vector<8x288xbf16>
    %c16_52 = arith.constant 16 : index
    %c0_53 = arith.constant 0 : index
    %48 = vector.load %arg7[%c16_52, %c0_53] : memref<72x288xbf16, #tpu.memory_space<vmem>>, vector<8x288xbf16>
    tpu.vector_store %arg7[%c16_52, %c0_53], %47 {strides = array<i32>} : memref<72x288xbf16, #tpu.memory_space<vmem>>, vector<8x288xbf16>,
    %c1_54 = arith.constant 1 : index
    %c0_55 = arith.constant 0 : index
    %c18_56 = arith.constant 18 : index
    %49 = vector.load %arg1[%c1_54, %c0_55, %c18_56] : memref<2x8x326xbf16, #tpu.memory_space<vmem>>, vector<1x8x288xbf16>
    %50 = vector.shape_cast %49 : vector<1x8x288xbf16> to vector<8x288xbf16>
    %c24_57 = arith.constant 24 : index
    %c0_58 = arith.constant 0 : index
    %51 = vector.load %arg7[%c24_57, %c0_58] : memref<72x288xbf16, #tpu.memory_space<vmem>>, vector<8x288xbf16>
    tpu.vector_store %arg7[%c24_57, %c0_58], %50 {strides = array<i32>} : memref<72x288xbf16, #tpu.memory_space<vmem>>, vector<8x288xbf16>,
    %c1_59 = arith.constant 1 : index
    %c0_60 = arith.constant 0 : index
    %c19_61 = arith.constant 19 : index
    %52 = vector.load %arg1[%c1_59, %c0_60, %c19_61] : memref<2x8x326xbf16, #tpu.memory_space<vmem>>, vector<1x8x288xbf16>
    %53 = vector.shape_cast %52 : vector<1x8x288xbf16> to vector<8x288xbf16>
    %c32_62 = arith.constant 32 : index
    %c0_63 = arith.constant 0 : index
    %54 = vector.load %arg7[%c32_62, %c0_63] : memref<72x288xbf16, #tpu.memory_space<vmem>>, vector<8x288xbf16>
    tpu.vector_store %arg7[%c32_62, %c0_63], %53 {strides = array<i32>} : memref<72x288xbf16, #tpu.memory_space<vmem>>, vector<8x288xbf16>,
    %c1_64 = arith.constant 1 : index
    %c0_65 = arith.constant 0 : index
    %c20_66 = arith.constant 20 : index
    %55 = vector.load %arg1[%c1_64, %c0_65, %c20_66] : memref<2x8x326xbf16, #tpu.memory_space<vmem>>, vector<1x8x288xbf16>
    %56 = vector.shape_cast %55 : vector<1x8x288xbf16> to vector<8x288xbf16>
    %c40_67 = arith.constant 40 : index
    %c0_68 = arith.constant 0 : index
    %57 = vector.load %arg7[%c40_67, %c0_68] : memref<72x288xbf16, #tpu.memory_space<vmem>>, vector<8x288xbf16>
    tpu.vector_store %arg7[%c40_67, %c0_68], %56 {strides = array<i32>} : memref<72x288xbf16, #tpu.memory_space<vmem>>, vector<8x288xbf16>,
    %c1_69 = arith.constant 1 : index
    %c0_70 = arith.constant 0 : index
    %c36_71 = arith.constant 36 : index
    %58 = vector.load %arg1[%c1_69, %c0_70, %c36_71] : memref<2x8x326xbf16, #tpu.memory_space<vmem>>, vector<1x8x288xbf16>
    %59 = vector.shape_cast %58 : vector<1x8x288xbf16> to vector<8x288xbf16>
    %c48_72 = arith.constant 48 : index
    %c0_73 = arith.constant 0 : index
    %60 = vector.load %arg7[%c48_72, %c0_73] : memref<72x288xbf16, #tpu.memory_space<vmem>>, vector<8x288xbf16>
    tpu.vector_store %arg7[%c48_72, %c0_73], %59 {strides = array<i32>} : memref<72x288xbf16, #tpu.memory_space<vmem>>, vector<8x288xbf16>,
    %c1_74 = arith.constant 1 : index
    %c0_75 = arith.constant 0 : index
    %c37_76 = arith.constant 37 : index
    %61 = vector.load %arg1[%c1_74, %c0_75, %c37_76] : memref<2x8x326xbf16, #tpu.memory_space<vmem>>, vector<1x8x288xbf16>
    %62 = vector.shape_cast %61 : vector<1x8x288xbf16> to vector<8x288xbf16>
    %c56_77 = arith.constant 56 : index
    %c0_78 = arith.constant 0 : index
    %63 = vector.load %arg7[%c56_77, %c0_78] : memref<72x288xbf16, #tpu.memory_space<vmem>>, vector<8x288xbf16>
    tpu.vector_store %arg7[%c56_77, %c0_78], %62 {strides = array<i32>} : memref<72x288xbf16, #tpu.memory_space<vmem>>, vector<8x288xbf16>,
    %c1_79 = arith.constant 1 : index
    %c0_80 = arith.constant 0 : index
    %c38_81 = arith.constant 38 : index
    %64 = vector.load %arg1[%c1_79, %c0_80, %c38_81] : memref<2x8x326xbf16, #tpu.memory_space<vmem>>, vector<1x8x288xbf16>
    %65 = vector.shape_cast %64 : vector<1x8x288xbf16> to vector<8x288xbf16>
    %c64_82 = arith.constant 64 : index
    %c0_83 = arith.constant 0 : index
    %66 = vector.load %arg7[%c64_82, %c0_83] : memref<72x288xbf16, #tpu.memory_space<vmem>>, vector<8x288xbf16>
    tpu.vector_store %arg7[%c64_82, %c0_83], %65 {strides = array<i32>} : memref<72x288xbf16, #tpu.memory_space<vmem>>, vector<8x288xbf16>,
    %c0_84 = arith.constant 0 : index
    %c0_85 = arith.constant 0 : index
    %67 = vector.load %arg2[%c0_84, %c0_85] : memref<16x72xbf16, #tpu.memory_space<vmem>>, vector<16x72xbf16>
    %c0_86 = arith.constant 0 : index
    %c0_87 = arith.constant 0 : index
    %68 = vector.load %arg7[%c0_86, %c0_87] : memref<72x288xbf16, #tpu.memory_space<vmem>>, vector<72x288xbf16>
    %cst_88 = arith.constant dense<0.000000e+00> : vector<16x288xf32>
    %69 = tpu.matmul %67, %68, %cst_88 {dimension_numbers = #tpu.dot_dimension_numbers<[1], [0], [0], [1], [0, 0, 1, 1], [], []>} : vector<16x72xbf16>, vector<72x288xbf16>, vector<16x288xf32> -> vector<16x288xf32>
    %c1_89 = arith.constant 1 : index
    %c0_90 = arith.constant 0 : index
    %c0_91 = arith.constant 0 : index
    %70 = vector.load %arg6[%c1_89, %c0_90, %c0_91] : memref<2x16x288xf32, #tpu.memory_space<vmem>>, vector<1x16x288xf32>
    %71 = vector.shape_cast %70 : vector<1x16x288xf32> to vector<16x288xf32>
    %72 = vector.shape_cast %69 : vector<16x288xf32> to vector<1x16x288xf32>
    tpu.vector_store %arg6[%c1_89, %c0_90, %c0_91], %72 {strides = array<i32>} : memref<2x16x288xf32, #tpu.memory_space<vmem>>, vector<1x16x288xf32>,
    %73 = vector.broadcast %0 : vector<1x288xf32> to vector<16x288xf32>
    %74 = arith.mulf %69, %73 : vector<16x288xf32>
    %cst_92 = arith.constant dense<0.000000e+00> : vector<16xf32>
    %75 = vector.multi_reduction <add>, %74, %cst_92 [1] : vector<16x288xf32> to vector<16xf32>
    %76 = vector.shape_cast %75 : vector<16xf32> to vector<16x1xf32>
    %77 = arith.addf %39, %76 : vector<16x1xf32>
    %cst_93 = arith.constant 0.001953125 : f32
    %78 = vector.broadcast %cst_93 : f32 to vector<16x1xf32>
    %79 = arith.mulf %77, %78 : vector<16x1xf32>
    %cst_94 = arith.constant 0.000000e+00 : f32
    %80 = vector.broadcast %cst_94 : f32 to vector<16x1xf32>
    %c0_95 = arith.constant 0 : index
    %c0_96 = arith.constant 0 : index
    %c0_97 = arith.constant 0 : index
    %81 = vector.load %arg6[%c0_95, %c0_96, %c0_97] : memref<2x16x288xf32, #tpu.memory_space<vmem>>, vector<1x16x288xf32>
    %82 = vector.shape_cast %81 : vector<1x16x288xf32> to vector<16x288xf32>
    %83 = vector.broadcast %79 : vector<16x1xf32> to vector<16x288xf32>
    %84 = arith.subf %82, %83 : vector<16x288xf32>
    %85 = vector.broadcast %0 : vector<1x288xf32> to vector<16x288xf32>
    %86 = arith.mulf %84, %85 : vector<16x288xf32>
    %87 = arith.mulf %86, %86 : vector<16x288xf32>
    %cst_98 = arith.constant dense<0.000000e+00> : vector<16xf32>
    %88 = vector.multi_reduction <add>, %87, %cst_98 [1] : vector<16x288xf32> to vector<16xf32>
    %89 = vector.shape_cast %88 : vector<16xf32> to vector<16x1xf32>
    %90 = arith.addf %80, %89 : vector<16x1xf32>
    %c1_99 = arith.constant 1 : index
    %c0_100 = arith.constant 0 : index
    %c0_101 = arith.constant 0 : index
    %91 = vector.load %arg6[%c1_99, %c0_100, %c0_101] : memref<2x16x288xf32, #tpu.memory_space<vmem>>, vector<1x16x288xf32>
    %92 = vector.shape_cast %91 : vector<1x16x288xf32> to vector<16x288xf32>
    %93 = vector.broadcast %79 : vector<16x1xf32> to vector<16x288xf32>
    %94 = arith.subf %92, %93 : vector<16x288xf32>
    %95 = vector.broadcast %0 : vector<1x288xf32> to vector<16x288xf32>
    %96 = arith.mulf %94, %95 : vector<16x288xf32>
    %97 = arith.mulf %96, %96 : vector<16x288xf32>
    %cst_102 = arith.constant dense<0.000000e+00> : vector<16xf32>
    %98 = vector.multi_reduction <add>, %97, %cst_102 [1] : vector<16x288xf32> to vector<16xf32>
    %99 = vector.shape_cast %98 : vector<16xf32> to vector<16x1xf32>
    %100 = arith.addf %90, %99 : vector<16x1xf32>
    %cst_103 = arith.constant 0.001953125 : f32
    %101 = vector.broadcast %cst_103 : f32 to vector<16x1xf32>
    %102 = arith.mulf %100, %101 : vector<16x1xf32>
    %cst_104 = arith.constant 9.99999974E-6 : f32
    %103 = vector.broadcast %cst_104 : f32 to vector<16x1xf32>
    %104 = arith.addf %102, %103 : vector<16x1xf32>
    %105 = math.rsqrt %104 : vector<16x1xf32>
    %c0_105 = arith.constant 0 : index
    %c0_106 = arith.constant 0 : index
    %106 = vector.load %arg4[%c0_105, %c0_106] : memref<16x1xf32, #tpu.memory_space<vmem>>, vector<16x1xf32>
    %107 = arith.mulf %105, %106 : vector<16x1xf32>
    %c0_107 = arith.constant 0 : index
    %c0_108 = arith.constant 0 : index
    %108 = vector.load %arg5[%c0_107, %c0_108] : memref<16x1xf32, #tpu.memory_space<vmem>>, vector<16x1xf32>
    %109 = arith.mulf %79, %107 : vector<16x1xf32>
    %110 = arith.subf %108, %109 : vector<16x1xf32>
    %c0_109 = arith.constant 0 : index
    %c0_110 = arith.constant 0 : index
    %c0_111 = arith.constant 0 : index
    %111 = vector.load %arg6[%c0_109, %c0_110, %c0_111] : memref<2x16x288xf32, #tpu.memory_space<vmem>>, vector<1x16x288xf32>
    %112 = vector.shape_cast %111 : vector<1x16x288xf32> to vector<16x288xf32>
    %113 = vector.broadcast %107 : vector<16x1xf32> to vector<16x288xf32>
    %114 = arith.mulf %112, %113 : vector<16x288xf32>
    %115 = vector.broadcast %110 : vector<16x1xf32> to vector<16x288xf32>
    %116 = arith.addf %114, %115 : vector<16x288xf32>
    %cst_112 = arith.constant 0.000000e+00 : f32
    %117 = vector.broadcast %cst_112 : f32 to vector<16x288xf32>
    %118 = arith.maximumf %116, %117 : vector<16x288xf32>
    %c0_113 = arith.constant 0 : index
    %c0_114 = arith.constant 0 : index
    %c0_115 = arith.constant 0 : index
    %119 = vector.load %arg6[%c0_113, %c0_114, %c0_115] : memref<2x16x288xf32, #tpu.memory_space<vmem>>, vector<1x16x288xf32>
    %120 = vector.shape_cast %119 : vector<1x16x288xf32> to vector<16x288xf32>
    %121 = vector.shape_cast %118 : vector<16x288xf32> to vector<1x16x288xf32>
    tpu.vector_store %arg6[%c0_113, %c0_114, %c0_115], %121 {strides = array<i32>} : memref<2x16x288xf32, #tpu.memory_space<vmem>>, vector<1x16x288xf32>,
    %c1_116 = arith.constant 1 : index
    %c0_117 = arith.constant 0 : index
    %c0_118 = arith.constant 0 : index
    %122 = vector.load %arg6[%c1_116, %c0_117, %c0_118] : memref<2x16x288xf32, #tpu.memory_space<vmem>>, vector<1x16x288xf32>
    %123 = vector.shape_cast %122 : vector<1x16x288xf32> to vector<16x288xf32>
    %124 = vector.broadcast %107 : vector<16x1xf32> to vector<16x288xf32>
    %125 = arith.mulf %123, %124 : vector<16x288xf32>
    %126 = vector.broadcast %110 : vector<16x1xf32> to vector<16x288xf32>
    %127 = arith.addf %125, %126 : vector<16x288xf32>
    %cst_119 = arith.constant 0.000000e+00 : f32
    %128 = vector.broadcast %cst_119 : f32 to vector<16x288xf32>
    %129 = arith.maximumf %127, %128 : vector<16x288xf32>
    %c1_120 = arith.constant 1 : index
    %c0_121 = arith.constant 0 : index
    %c0_122 = arith.constant 0 : index
    %130 = vector.load %arg6[%c1_120, %c0_121, %c0_122] : memref<2x16x288xf32, #tpu.memory_space<vmem>>, vector<1x16x288xf32>
    %131 = vector.shape_cast %130 : vector<1x16x288xf32> to vector<16x288xf32>
    %132 = vector.shape_cast %129 : vector<16x288xf32> to vector<1x16x288xf32>
    tpu.vector_store %arg6[%c1_120, %c0_121, %c0_122], %132 {strides = array<i32>} : memref<2x16x288xf32, #tpu.memory_space<vmem>>, vector<1x16x288xf32>,
    return
  }
  func.func @transform_0(%arg0: i32) -> (i32, i32, i32) {
    %c0_i32 = arith.constant 0 : i32
    %c0_i32_0 = arith.constant 0 : i32
    %c0_i32_1 = arith.constant 0 : i32
    %c0_i32_2 = arith.constant 0 : i32
    return %c0_i32, %c0_i32_0, %c0_i32_1 : i32, i32, i32
  }
  func.func @transform_1(%arg0: i32) -> (i32, i32) {
    %c0_i32 = arith.constant 0 : i32
    %c0_i32_0 = arith.constant 0 : i32
    %c0_i32_1 = arith.constant 0 : i32
    return %c0_i32, %c0_i32_0 : i32, i32
  }
  func.func @transform_2(%arg0: i32) -> (i32, i32) {
    %c0_i32 = arith.constant 0 : i32
    %c0_i32_0 = arith.constant 0 : i32
    %c0_i32_1 = arith.constant 0 : i32
    return %c0_i32, %c0_i32_0 : i32, i32
  }
  func.func @transform_3(%arg0: i32) -> (i32, i32) {
    %c0_i32 = arith.constant 0 : i32
    %c0_i32_0 = arith.constant 0 : i32
    %c0_i32_1 = arith.constant 0 : i32
    return %c0_i32, %c0_i32_0 : i32, i32
  }
  func.func @transform_4(%arg0: i32) -> (i32, i32) {
    %c0_i32 = arith.constant 0 : i32
    %c0_i32_0 = arith.constant 0 : i32
    %c0_i32_1 = arith.constant 0 : i32
    return %c0_i32, %c0_i32_0 : i32, i32
  }
  func.func @transform_5(%arg0: i32) -> (i32, i32, i32) {
    %c0_i32 = arith.constant 0 : i32
    %c0_i32_0 = arith.constant 0 : i32
    %c0_i32_1 = arith.constant 0 : i32
    %c0_i32_2 = arith.constant 0 : i32
    return %c0_i32, %c0_i32_0, %c0_i32_1 : i32, i32, i32
  }
}

</mosaic_0001>

<bundles_post_ra>
// kernel: conv_block.1
= control target key start
LH: loop header
LB: loop body
LE: loop exit
PB: predicated region body
PF: predicated region fallthrough
CT: control target
= control target key end

     0   :  { %s1068_s20 = smov 126   ;;  %s1069_s21 = smov 127   ;;  %vm25_vm0 = vcmask 257024   ;;  %v1070_v6 = vmov 0.0   ;;  %v1076_v12 = vmov 0   ;;  %vm1078_vm1 = vmmov 0   ;;  %s1500_s0 = inlined_call_operand.vmem [shape: bf16[2,8,326], index: 0, kind: input, shape index: {}]   ;;  %s1501_s1 = inlined_call_operand.vmem [shape: bf16[16,72], index: 1, kind: input, shape index: {}]   ;;  %s1502_s2 = inlined_call_operand.vmem [shape: f32[1,288], index: 2, kind: input, shape index: {}]   ;;  %s1503_s5 = inlined_call_operand.vmem [shape: f32[2,16,288], index: 5, kind: output, shape index: {}]   ;;  %s1504_s3 = inlined_call_operand.vmem [shape: f32[16,1], index: 3, kind: input, shape index: {}]   ;;  %s1505_s4 = inlined_call_operand.vmem [shape: f32[16,1], index: 4, kind: input, shape index: {}]  }
   0x1   :  { %v1112_v0 = vld [vmem:[%s1500_s0] sm:$0xff]  ;;  %v46_v1 = vld [vmem:[%s1500_s0 + $0x8] sm:$0xf]  ;;  %v1127_v3 = vld [vmem:[%s1500_s0 + $0xc] sm:$0xff]  ;;  %1011 = vmatprep.subr.bf16.mxu1 %v1070_v6  ;;  %s1071_s7 = smov 110   ;;  %s1072_s10 = smov 109   ;;  %307 = vmatprep.mubr.bf16.mxu0 %v1076_v12 }
   0x2   :  { %49 = vrot.lane.b32.xlu1 %v1112_v0, %s1068_s20  ;;  %31 = vrot.lane.b32.xlu0 %v1112_v0, %s1069_s21  ;;  %v28_v2 = vld [vmem:[%s1500_s0 + $0x8] sm:$0xf]  ;;  %s1073_s13 = smov 108   ;;  %s1074_s16 = smov 92   ;;  %v941_v13 = vld [vmem:[%s1500_s0 + $0x14] sm:$0xf] }
   0x3   :  { %v63_v4 = vld [vmem:[%s1500_s0 + $0x8] sm:$0xf]  ;;  %s1075_s23 = smov 91   ;;  %1050 = vset.pattern.permute.xlu1 %v1076_v12  ;;  %1051 = vset.pattern.permute.xlu0 %v1076_v12  ;;  %s1077_s24 = smov 90   ;;  %v943_v14 = vld [vmem:[%s1500_s0 + $0x14] sm:$0xf] }
   0x4   :  { %v23_v5 = vld [vmem:[%s1500_s0 + $0x8] sm:$0xf]  ;;  %1021 = vmatprep.mubr.msk.bf16.mxu1 %vm1078_vm1, %v1070_v6  ;;  %v945_v15 = vld [vmem:[%s1500_s0 + $0x14] sm:$0xf]  ;;  %vm37_vm2 = vcmask 1043456   ;;  %vm39_vm3 = vcmask 1039360  }
   0x5   :  { %26 = vst.msk [vmem:[#allocation2 + $0x8] sm:$0xf] %vm25_vm0, %v23_v5  ;;  %v80_v7 = vld [vmem:[%s1500_s0 + $0x8] sm:$0xf]  ;;  %v947_v16 = vld [vmem:[%s1500_s0 + $0x14] sm:$0xf] }
   0x6   :  { %51 = vrot.lane.b32.xlu1 %v46_v1, %s1068_s20  ;;  %33 = vrot.lane.b32.xlu0 %v28_v2, %s1069_s21  ;;  %v97_v8 = vld [vmem:[%s1500_s0 + $0x8] sm:$0xf]  ;;  %v949_v17 = vld [vmem:[%s1500_s0 + $0x14] sm:$0xf]  ;;  %vm56_vm4 = vcmask 1031168   ;;  %vm73_vm5 = vcmask 900096  }
   0x7   :  { %v114_v9 = vld [vmem:[%s1500_s0 + $0x8] sm:$0xf]  ;;  %v951_v18 = vld [vmem:[%s1500_s0 + $0x14] sm:$0xf]  ;;  %vm90_vm6 = vcmask 891904   ;;  %vm107_vm7 = vcmask 883712  }
   0x8   :  { %v131_v10 = vld [vmem:[%s1500_s0 + $0x8] sm:$0xf]  ;;  %v953_v19 = vld [vmem:[%s1500_s0 + $0x14] sm:$0xf]  ;;  %vm124_vm8 = vcmask 752640   ;;  %vm141_vm9 = vcmask 744448  }
   0x9   :  { %v148_v11 = vld [vmem:[%s1500_s0 + $0x8] sm:$0xf]  ;;  %v955_v20 = vld [vmem:[%s1500_s0 + $0x14] sm:$0xf]  ;;  %vm158_vm10 = vcmask 736256   ;;  %vm261_vm11 = vcmask 588800  }
   0xa   :  { %68 = vrot.lane.b32.xlu1 %v63_v4, %s1071_s7  ;;  %66 = vrot.lane.b32.xlu0 %v1112_v0, %s1071_s7  ;;  %v939_v38 = vld [vmem:[%s1500_s0 + $0x14] sm:$0xf]  ;;  %vm361_vm12 = vcmask 261120  }
   0xe   :  { %85 = vrot.lane.b32.xlu1 %v80_v7, %s1072_s10  ;;  %83 = vrot.lane.b32.xlu0 %v1112_v0, %s1072_s10 }
  0x12   :  { %102 = vrot.lane.b32.xlu1 %v97_v8, %s1073_s13  ;;  %100 = vrot.lane.b32.xlu0 %v1112_v0, %s1073_s13 }
  0x16   :  { %119 = vrot.lane.b32.xlu1 %v114_v9, %s1074_s16  ;;  %117 = vrot.lane.b32.xlu0 %v1112_v0, %s1074_s16 }
  0x1a   :  { %136 = vrot.lane.b32.xlu1 %v131_v10, %s1075_s23  ;;  %134 = vrot.lane.b32.xlu0 %v1112_v0, %s1075_s23 }
  0x1e   :  { %153 = vrot.lane.b32.xlu1 %v148_v11, %s1077_s24  ;;  %151 = vrot.lane.b32.xlu0 %v1112_v0, %s1077_s24 }
  0x22   :  { %411 = vrot.lane.b32.xlu1 %v941_v13, %s1069_s21  ;;  %409 = vrot.lane.b32.xlu0 %v1127_v3, %s1069_s21 }
  0x26   :  { %427 = vrot.lane.b32.xlu1 %v943_v14, %s1068_s20  ;;  %425 = vrot.lane.b32.xlu0 %v1127_v3, %s1068_s20 }
  0x2a   :  { %443 = vrot.lane.b32.xlu1 %v945_v15, %s1071_s7  ;;  %441 = vrot.lane.b32.xlu0 %v1127_v3, %s1071_s7 }
  0x2e   :  { %459 = vrot.lane.b32.xlu1 %v947_v16, %s1072_s10  ;;  %457 = vrot.lane.b32.xlu0 %v1127_v3, %s1072_s10 }
  0x32   :  { %475 = vrot.lane.b32.xlu1 %v949_v17, %s1073_s13  ;;  %473 = vrot.lane.b32.xlu0 %v1127_v3, %s1073_s13 }
  0x36   :  { %491 = vrot.lane.b32.xlu1 %v951_v18, %s1074_s16  ;;  %489 = vrot.lane.b32.xlu0 %v1127_v3, %s1074_s16 }
  0x3a   :  { %507 = vrot.lane.b32.xlu1 %v953_v19, %s1075_s23  ;;  %505 = vrot.lane.b32.xlu0 %v1127_v3, %s1075_s23 }
  0x3e   :  { %523 = vrot.lane.b32.xlu1 %v955_v20, %s1077_s24  ;;  %521 = vrot.lane.b32.xlu0 %v1127_v3, %s1077_s24 }
  0x74   :  { %v50_v21 = vpop.permute.xlu1 %49  ;;  %v32_v22 = vpop.permute.xlu0 %31 }
  0x75   :  { %v35_v25 = vrot.slane %v32_v22, 4  ;;  %v53_v28 = vrot.slane %v50_v21, 4 }
  0x78   :  { %v52_v23 = vpop.permute.xlu1 %51  ;;  %v34_v24 = vpop.permute.xlu0 %33 }
  0x79   :  { %v54_v26 = vrot.slane %v52_v23, 4  ;;  %61 = vst.msk [vmem:[#allocation2 + $0x20] sm:$0xf] %vm25_vm0, %v52_v23  ;;  %v36_v27 = vrot.slane %v34_v24, 4  ;;  %44 = vst.msk [vmem:[#allocation2 + $0x14] sm:$0xf] %vm25_vm0, %v34_v24 }
  0x7b   :  { %v38_v29 = vsel %vm37_vm2, %v35_v25, %v36_v27  ;;  %v55_v30 = vsel %vm37_vm2, %v53_v28, %v54_v26 }
  0x7c   :  { %v40_v31 = vsel %vm39_vm3, %v32_v22, %v38_v29  ;;  %v69_v32 = vpop.permute.xlu1 %68  ;;  %v67_v33 = vpop.permute.xlu0 %66  ;;  %v57_v40 = vsel %vm56_vm4, %v50_v21, %v55_v30 }
  0x7d   :  { %v71_v34 = vrot.slane %v69_v32, 4  ;;  %78 = vst.msk [vmem:[#allocation2 + $0x2c] sm:$0xf] %vm25_vm0, %v69_v32  ;;  %v70_v35 = vrot.slane %v67_v33, 4  ;;  %v921_v36 = vcombine.high %v1112_v0, %v40_v31  ;;  %v920_v37 = vcombine.low %v1112_v0, %v40_v31 }
  0x7f   :  { %v72_v39 = vsel %vm37_vm2, %v70_v35, %v71_v34  ;;  %275 = vmatprep.subr.bf16.mxu0 %v921_v36 }
  0x80   :  { %v74_v41 = vsel %vm73_vm5, %v67_v33, %v72_v39  ;;  %v86_v42 = vpop.permute.xlu1 %85  ;;  %v84_v43 = vpop.permute.xlu0 %83  ;;  %v1052_v44 = vld [vmem:[#allocation2 + $0x8] ss:$12 sps:$4 sm:$0xff]   ;;  %276 = vmatpush1.bf16.msra.mxu0 %v920_v37  ;;  %v1057_v33 = vld [vmem:[%s1501_s1] sm:$0xff]  }
  0x81   :  { %v88_v45 = vrot.slane %v86_v42, 4  ;;  %95 = vst.msk [vmem:[#allocation2 + $0x38] sm:$0xf] %vm25_vm0, %v86_v42  ;;  %v87_v46 = vrot.slane %v84_v43, 4  ;;  %404 = vst.msk [vmem:[#allocation2 + $0x8] sm:$0xf] %vm25_vm0, %v939_v38  ;;  %v924_v47 = vcombine.high %v57_v40, %v74_v41  ;;  %v923_v48 = vcombine.low %v57_v40, %v74_v41  ;;  %1012 = vmatpush3.bf16.msra.mxu1 %v1052_v44 }
  0x82   :  { %1013 = vmatprep.subr.bf16.mxu1 %v1070_v6 }
  0x83   :  { %277 = vmatprep.subr.bf16.mxu0 %v924_v47  ;;  %v89_v52 = vsel %vm37_vm2, %v87_v46, %v88_v45 }
  0x84   :  { %v103_v49 = vpop.permute.xlu1 %102  ;;  %v101_v50 = vpop.permute.xlu0 %100  ;;  %v1053_v51 = vld [vmem:[#allocation2 + $0x20] ss:$12 sps:$4 sm:$0xff]   ;;  %278 = vmatpush1.bf16.msra.mxu0 %v923_v48  ;;  %v91_v56 = vsel %vm90_vm6, %v84_v43, %v89_v52 }
  0x85   :  { %v105_v53 = vrot.slane %v103_v49, 4  ;;  %112 = vst.msk [vmem:[#allocation2 + $0x44] sm:$0xf] %vm25_vm0, %v103_v49  ;;  %v104_v54 = vrot.slane %v101_v50, 4  ;;  %1014 = vmatpush3.bf16.msra.mxu1 %v1053_v51 }
  0x86   :  { %1015 = vmatprep.subr.bf16.mxu1 %v1070_v6 }
  0x87   :  { %v106_v55 = vsel %vm37_vm2, %v104_v54, %v105_v53 }
  0x88   :  { %v108_v57 = vsel %vm107_vm7, %v101_v50, %v106_v55  ;;  %v120_v58 = vpop.permute.xlu1 %119  ;;  %v118_v59 = vpop.permute.xlu0 %117 }
  0x89   :  { %v122_v60 = vrot.slane %v120_v58, 4  ;;  %129 = vst.msk [vmem:[#allocation2 + $0x50] sm:$0xf] %vm25_vm0, %v120_v58  ;;  %v121_v61 = vrot.slane %v118_v59, 4  ;;  %v927_v62 = vcombine.high %v91_v56, %v108_v57  ;;  %v926_v63 = vcombine.low %v91_v56, %v108_v57 }
  0x8b   :  { %279 = vmatprep.subr.bf16.mxu0 %v927_v62  ;;  %v123_v4 = vsel %vm37_vm2, %v121_v61, %v122_v60 }
  0x8c   :  { %v137_v0 = vpop.permute.xlu1 %136  ;;  %v135_v1 = vpop.permute.xlu0 %134  ;;  %v1054_v2 = vld [vmem:[#allocation2 + $0x38] ss:$12 sps:$4 sm:$0xff]   ;;  %280 = vmatpush1.bf16.msra.mxu0 %v926_v63  ;;  %v125_v9 = vsel %vm124_vm8, %v118_v59, %v123_v4 }
  0x8d   :  { %v139_v5 = vrot.slane %v137_v0, 4  ;;  %146 = vst.msk [vmem:[#allocation2 + $0x5c] sm:$0xf] %vm25_vm0, %v137_v0  ;;  %v138_v7 = vrot.slane %v135_v1, 4  ;;  %1016 = vmatpush3.bf16.msra.mxu1 %v1054_v2 }
  0x8e   :  { %1017 = vmatprep.subr.bf16.mxu1 %v1070_v6 }
  0x8f   :  { %v140_v8 = vsel %vm37_vm2, %v138_v7, %v139_v5 }
  0x90   :  { %v142_v10 = vsel %vm141_vm9, %v135_v1, %v140_v8  ;;  %v154_v11 = vpop.permute.xlu1 %153  ;;  %v152_v13 = vpop.permute.xlu0 %151 }
  0x91   :  { %v156_v14 = vrot.slane %v154_v11, 4  ;;  %163 = vst.msk [vmem:[#allocation2 + $0x68] sm:$0xf] %vm25_vm0, %v154_v11  ;;  %v155_v15 = vrot.slane %v152_v13, 4  ;;  %v930_v16 = vcombine.high %v125_v9, %v142_v10  ;;  %v929_v17 = vcombine.low %v125_v9, %v142_v10 }
  0x93   :  { %v157_v18 = vsel %vm37_vm2, %v155_v15, %v156_v14  ;;  %281 = vmatprep.subr.bf16.mxu0 %v930_v16 }
  0x94   :  { %v159_v19 = vsel %vm158_vm10, %v152_v13, %v157_v18  ;;  %v412_v20 = vpop.permute.xlu1 %411  ;;  %v410_v21 = vpop.permute.xlu0 %409  ;;  %v1055_v22 = vld [vmem:[#allocation2 + $0x50] ss:$12 sps:$4 sm:$0xff]   ;;  %282 = vmatpush1.bf16.msra.mxu0 %v929_v17 }
  0x95   :  { %v414_v23 = vrot.slane %v412_v20, 4  ;;  %420 = vst.msk [vmem:[#allocation2 + $0x14] sm:$0xf] %vm25_vm0, %v412_v20  ;;  %v413_v24 = vrot.slane %v410_v21, 4  ;;  %v933_v25 = vcombine.high %v159_v19, %v159_v19  ;;  %v932_v26 = vcombine.low %v159_v19, %v159_v19  ;;  %1018 = vmatpush3.bf16.msra.mxu1 %v1055_v22 }
  0x96   :  { %1019 = vmatprep.subr.bf16.mxu1 %v1070_v6 }
  0x97   :  { %v415_v27 = vsel %vm37_vm2, %v413_v24, %v414_v23  ;;  %935 = vmatprep.subr.msk.bf16.mxu0 %vm37_vm2, %v933_v25  ;;  %v267_v28 = vsel %vm37_vm2, %v932_v26, 0 }
  0x98   :  { %v416_v29 = vsel %vm39_vm3, %v410_v21, %v415_v27  ;;  %v428_v30 = vpop.permute.xlu1 %427  ;;  %v426_v31 = vpop.permute.xlu0 %425  ;;  %v1056_v32 = vld [vmem:[#allocation2 + $0x68] ss:$0 sps:$4 sm:$0xff]   ;;  %284 = vmatpush1.bf16.msra.mxu0 %v267_v28  ;;  %v1063_v27 = vld [vmem:[%s1501_s1] sm:$0xff]  }
  0x99   :  { %v430_v34 = vrot.slane %v428_v30, 4  ;;  %436 = vst.msk [vmem:[#allocation2 + $0x20] sm:$0xf] %vm25_vm0, %v428_v30  ;;  %v429_v35 = vrot.slane %v426_v31, 4  ;;  %v957_v36 = vcombine.low %v1127_v3, %v416_v29  ;;  %v958_v37 = vcombine.high %v1127_v3, %v416_v29 }
  0x9a   :  { %v273_v38 = vsel %vm37_vm2, %v1056_v32, 0  ;;  %v367_v30 = vlaneseq  ;;  %v21_v32 = vld [vmem:[%s1502_s2] sm:$0x7] }
  0x9b   :  { %v431_v39 = vsel %vm37_vm2, %v429_v35, %v430_v34  ;;  %1020 = vmatpush3.bf16.msra.mxu1 %v273_v38  ;;  %642 = vmatprep.subr.bf16.mxu0 %v958_v37 }
  0x9c   :  { %v432_v40 = vsel %vm56_vm4, %v426_v31, %v431_v39  ;;  %v444_v41 = vpop.permute.xlu1 %443  ;;  %v442_v42 = vpop.permute.xlu0 %441  ;;  %1025 = vmatprep.subr.bf16.mxu1 %v1070_v6  ;;  %v1058_v43 = vld [vmem:[#allocation2 + $0x8] ss:$12 sps:$4 sm:$0xff]   ;;  %936 = vmatmul.mubr.msk.bf16.vlgmr.msra.gmra.mrb[0].mxu0 %vm261_vm11, %v1057_v33  ;;  %v368_v31 = vshrl.u32 %v367_v30, 7 }
  0x9d   :  { %v446_v44 = vrot.slane %v444_v41, 4  ;;  %452 = vst.msk [vmem:[#allocation2 + $0x2c] sm:$0xf] %vm25_vm0, %v444_v41  ;;  %v445_v45 = vrot.slane %v442_v42, 4  ;;  %643 = vmatpush1.bf16.msra.mxu0 %v957_v36  ;;  %674 = vmatprep.mubr.bf16.mxu0 %v1076_v12 }
  0x9e   :  { %1022 = vmatmul.mubr.msk.bf16.vlgmr.msra.gmra.mrb[0].mxu1 %vm261_vm11, %v1057_v33  ;;  %v373_v33 = vsub.s32 1, %v368_v31  ;;  %v377_v34 = vsub.s32 2, %v368_v31 }
  0x9f   :  { %v447_v3 = vsel %vm37_vm2, %v445_v45, %v446_v44  ;;  %1026 = vmatpush3.bf16.msra.mxu1 %v1058_v43  ;;  %1035 = vmatprep.mubr.msk.bf16.mxu1 %vm1078_vm1, %v1070_v6 }
  0xa0   :  { %v448_v46 = vsel %vm73_vm5, %v442_v42, %v447_v3  ;;  %v460_v47 = vpop.permute.xlu1 %459  ;;  %v458_v48 = vpop.permute.xlu0 %457  ;;  %1027 = vmatprep.subr.bf16.mxu1 %v1070_v6  ;;  %v1310_v36 = vrot.slane %v21_v32, %v373_v33  ;;  %v1312_v37 = vrot.slane %v21_v32, %v377_v34 }
  0xa1   :  { %v462_v49 = vrot.slane %v460_v47, 4  ;;  %468 = vst.msk [vmem:[#allocation2 + $0x38] sm:$0xf] %vm25_vm0, %v460_v47  ;;  %v461_v50 = vrot.slane %v458_v48, 4  ;;  %v960_v51 = vcombine.low %v432_v40, %v448_v46  ;;  %v961_v12 = vcombine.high %v432_v40, %v448_v46 }
  0xa3   :  { %v463_v52 = vsel %vm37_vm2, %v461_v50, %v462_v49  ;;  %644 = vmatprep.subr.bf16.mxu0 %v961_v12 }
  0xa4   :  { %v464_v53 = vsel %vm90_vm6, %v458_v48, %v463_v52  ;;  %v476_v54 = vpop.permute.xlu1 %475  ;;  %v474_v55 = vpop.permute.xlu0 %473  ;;  %v1059_v56 = vld [vmem:[#allocation2 + $0x20] ss:$12 sps:$4 sm:$0xff]   ;;  %645 = vmatpush1.bf16.msra.mxu0 %v960_v51 }
  0xa5   :  { %v478_v57 = vrot.slane %v476_v54, 4  ;;  %484 = vst.msk [vmem:[#allocation2 + $0x44] sm:$0xf] %vm25_vm0, %v476_v54  ;;  %v477_v58 = vrot.slane %v474_v55, 4  ;;  %1028 = vmatpush3.bf16.msra.mxu1 %v1059_v56 }
  0xa6   :  { %1029 = vmatprep.subr.bf16.mxu1 %v1070_v6 }
  0xa7   :  { %v479_v59 = vsel %vm37_vm2, %v477_v58, %v478_v57 }
  0xa8   :  { %v480_v60 = vsel %vm107_vm7, %v474_v55, %v479_v59  ;;  %v492_v61 = vpop.permute.xlu1 %491  ;;  %v490_v62 = vpop.permute.xlu0 %489 }
  0xa9   :  { %v494_v63 = vrot.slane %v492_v61, 4  ;;  %500 = vst.msk [vmem:[#allocation2 + $0x50] sm:$0xf] %vm25_vm0, %v492_v61  ;;  %v493_v0 = vrot.slane %v490_v62, 4  ;;  %v963_v1 = vcombine.low %v464_v53, %v480_v60  ;;  %v964_v2 = vcombine.high %v464_v53, %v480_v60 }
  0xab   :  { %v495_v4 = vsel %vm37_vm2, %v493_v0, %v494_v63  ;;  %646 = vmatprep.subr.bf16.mxu0 %v964_v2 }
  0xac   :  { %v496_v5 = vsel %vm124_vm8, %v490_v62, %v495_v4  ;;  %v508_v7 = vpop.permute.xlu1 %507  ;;  %v506_v8 = vpop.permute.xlu0 %505  ;;  %v1060_v9 = vld [vmem:[#allocation2 + $0x38] ss:$12 sps:$4 sm:$0xff]   ;;  %647 = vmatpush1.bf16.msra.mxu0 %v963_v1 }
  0xad   :  { %v510_v10 = vrot.slane %v508_v7, 4  ;;  %516 = vst.msk [vmem:[#allocation2 + $0x5c] sm:$0xf] %vm25_vm0, %v508_v7  ;;  %v509_v11 = vrot.slane %v506_v8, 4  ;;  %1030 = vmatpush3.bf16.msra.mxu1 %v1060_v9 }
  0xae   :  { %1031 = vmatprep.subr.bf16.mxu1 %v1070_v6 }
  0xaf   :  { %v511_v13 = vsel %vm37_vm2, %v509_v11, %v510_v10 }
  0xb0   :  { %v512_v14 = vsel %vm141_vm9, %v506_v8, %v511_v13  ;;  %v524_v15 = vpop.permute.xlu1 %523  ;;  %v522_v16 = vpop.permute.xlu0 %521 }
  0xb1   :  { %v526_v17 = vrot.slane %v524_v15, 4  ;;  %532 = vst.msk [vmem:[#allocation2 + $0x68] sm:$0xf] %vm25_vm0, %v524_v15  ;;  %v525_v18 = vrot.slane %v522_v16, 4  ;;  %v966_v19 = vcombine.low %v496_v5, %v512_v14  ;;  %v967_v20 = vcombine.high %v496_v5, %v512_v14 }
  0xb3   :  { %v527_v21 = vsel %vm37_vm2, %v525_v18, %v526_v17  ;;  %648 = vmatprep.subr.bf16.mxu0 %v967_v20 }
  0xb4   :  { %v528_v22 = vsel %vm158_vm10, %v522_v16, %v527_v21  ;;  %v1061_v23 = vld [vmem:[#allocation2 + $0x50] ss:$12 sps:$4 sm:$0xff]   ;;  %649 = vmatpush1.bf16.msra.mxu0 %v966_v19 }
  0xb5   :  { %v970_v24 = vcombine.high %v528_v22, %v528_v22  ;;  %v969_v25 = vcombine.low %v528_v22, %v528_v22  ;;  %1032 = vmatpush3.bf16.msra.mxu1 %v1061_v23 }
  0xb6   :  { %1033 = vmatprep.subr.bf16.mxu1 %v1070_v6  ;;  %v369_v6 = vsub.s32 0, %v368_v31 }
  0xb7   :  { %972 = vmatprep.subr.msk.bf16.mxu0 %vm37_vm2, %v970_v24  ;;  %v634_v26 = vsel %vm37_vm2, %v969_v25, 0 }
  0xb8   :  { %v1062_v28 = vld [vmem:[#allocation2 + $0x68] ss:$0 sps:$4 sm:$0xff]   ;;  %651 = vmatpush1.bf16.msra.mxu0 %v634_v26  ;;  %v1308_v35 = vrot.slane %v21_v32, %v369_v6 }
  0xb9   :  { %v640_v29 = vsel %vm37_vm2, %v1062_v28, 0 }
  0xba   :  { %1034 = vmatpush3.bf16.msra.mxu1 %v640_v29 }
  0xbb   :  { %973 = vmatmul.mubr.msk.bf16.vlgmr.msra.gmra.mrb[4].mxu0 %vm261_vm11, %v1063_v27 }
  0xbd   :  { %1036 = vmatmul.mubr.msk.bf16.vlgmr.msra.gmra.mrb[4].mxu1 %vm261_vm11, %v1063_v27 }
 0x16f   :  { %v1314_v38 = vpop.f32.mrb[0].mxu0 }
 0x170   :  { %v382_v39 = vmul.f32 %v1308_v35, %v1314_v38  ;;  %v1318_v40 = vpop.f32.mrb[1].mxu0 }
 0x171   :  { %v383_v41 = vmul.f32 %v1310_v36, %v1318_v40  ;;  %v1322_v42 = vpop.f32.mrb[2].mxu0  ;;  %v352_v43 = vpop.f32.mrb[0].mxu1 }
 0x172   :  { %v385_v44 = vmul.f32 %v1308_v35, %v1322_v42  ;;  %362 = vst.msk [vmem:[%s1503_s5 + $0x10] sm:$0xff] %vm361_vm12, %v352_v43  ;;  %v384_v45 = vmul.f32 %v1312_v37, %v352_v43  ;;  %v1331_v3 = vpop.f32.mrb[3].mxu0  ;;  %v1023_v46 = vpop.f32.mrb[1].mxu1 }
 0x173   :  { %v386_v47 = vmul.f32 %v1310_v36, %v1331_v3  ;;  %v355_v48 = vpop.f32.mrb[2].mxu1  ;;  %v388_v49 = vadd.f32 %v383_v41, %v382_v39 }
 0x174   :  { %365 = vst.msk [vmem:[%s1503_s5 + $0x28] sm:$0xff] %vm361_vm12, %v355_v48  ;;  %v387_v50 = vmul.f32 %v1312_v37, %v355_v48  ;;  %v1024_v51 = vpop.f32.mrb[3].mxu1  ;;  %v389_v12 = vsel %vm361_vm12, %v384_v45, 0.0 }
 0x175   :  { %v390_v52 = vadd.f32 %v389_v12, %v388_v49  ;;  %v393_v53 = vadd.f32 %v386_v47, %v385_v44 }
 0x176   :  { %v394_v54 = vsel %vm361_vm12, %v387_v50, 0.0 }
 0x177   :  { %391 = vadd.xlane.f32.xlu0 %v390_v52  ;;  %v395_v55 = vadd.f32 %v394_v54, %v393_v53 }
 0x179   :  { %396 = vadd.xlane.f32.xlu1 %v395_v55  ;;  %v1375_v21 = vld [vmem:[%s1503_s5 + $0x10] sm:$0xff] }
 0x17b   :  { %v1407_v49 = vld [vmem:[%s1503_s5 + $0x28] sm:$0xff] }
 0x18e   :  { %v1342_v56 = vpop.f32.mrb[4].mxu0 }
 0x18f   :  { %v733_v57 = vmul.f32 %v1342_v56, %v1308_v35  ;;  %v1346_v58 = vpop.f32.mrb[5].mxu0 }
 0x190   :  { %v734_v59 = vmul.f32 %v1346_v58, %v1310_v36  ;;  %v1350_v60 = vpop.f32.mrb[6].mxu0  ;;  %v719_v61 = vpop.f32.mrb[4].mxu1 }
 0x191   :  { %v736_v62 = vmul.f32 %v1350_v60, %v1308_v35  ;;  %v1354_v63 = vpop.f32.mrb[7].mxu0  ;;  %977 = vst.msk [vmem:[%s1503_s5 + $0x40] sm:$0xff] %vm361_vm12, %v719_v61  ;;  %v735_v0 = vmul.f32 %v719_v61, %v1312_v37  ;;  %v1037_v1 = vpop.f32.mrb[5].mxu1 }
 0x192   :  { %v737_v2 = vmul.f32 %v1354_v63, %v1310_v36  ;;  %v739_v4 = vadd.f32 %v734_v59, %v733_v57  ;;  %v722_v5 = vpop.f32.mrb[6].mxu1 }
 0x193   :  { %980 = vst.msk [vmem:[%s1503_s5 + $0x58] sm:$0xff] %vm361_vm12, %v722_v5  ;;  %v738_v7 = vmul.f32 %v722_v5, %v1312_v37  ;;  %v1038_v8 = vpop.f32.mrb[7].mxu1  ;;  %v740_v10 = vsel %vm361_vm12, %v735_v0, 0.0 }
 0x194   :  { %v744_v9 = vadd.f32 %v737_v2, %v736_v62  ;;  %v741_v11 = vadd.f32 %v740_v10, %v739_v4 }
 0x195   :  { %v745_v13 = vsel %vm361_vm12, %v738_v7, 0.0 }
 0x196   :  { %742 = vadd.xlane.f32.xlu0 %v741_v11  ;;  %v746_v14 = vadd.f32 %v745_v13, %v744_v9 }
 0x198   :  { %v1386_v26 = vld [vmem:[%s1503_s5 + $0x40] sm:$0xff] }
 0x19a   :  { %747 = vadd.xlane.f32.xlu0 %v746_v14  ;;  %v1422_v0 = vld [vmem:[%s1503_s5 + $0x58] sm:$0xff] }
 0x204   :  { %v392_v15 = vpop.xlane.xlu0 %391 }
 0x206   :  { %v397_v19 = vpop.xlane.xlu1 %396 }
 0x223   :  { %v743_v16 = vpop.xlane.xlu0 %742 }
 0x224   :  { %v749_v17 = vadd.f32 %v743_v16, %v392_v15 }
 0x226   :  { %v1370_v18 = vmul.f32 0.001953125, %v749_v17 }
 0x227   :  { %v748_v20 = vpop.xlane.xlu0 %747 }
 0x228   :  { %v750_v22 = vadd.f32 %v748_v20, %v397_v19  ;;  %v759_v23 = vsub.f32 %v1314_v38, %v1370_v18  ;;  %v760_v24 = vsub.f32 %v1318_v40, %v1370_v18  ;;  %v761_v25 = vsub.f32 %v1375_v21, %v1370_v18 }
 0x229   :  { %v795_v27 = vsub.f32 %v1342_v56, %v1370_v18  ;;  %v796_v28 = vsub.f32 %v1346_v58, %v1370_v18  ;;  %v797_v29 = vsub.f32 %v1386_v26, %v1370_v18 }
 0x22a   :  { %v1394_v30 = vmul.f32 0.001953125, %v750_v22  ;;  %v765_v31 = vmul.f32 %v759_v23, %v1308_v35  ;;  %v766_v6 = vmul.f32 %v760_v24, %v1310_v36  ;;  %v767_v32 = vmul.f32 %v761_v25, %v1312_v37 }
 0x22b   :  { %v801_v33 = vmul.f32 %v795_v27, %v1308_v35  ;;  %v802_v34 = vmul.f32 %v796_v28, %v1310_v36  ;;  %v803_v39 = vmul.f32 %v797_v29, %v1312_v37 }
 0x22c   :  { %v771_v41 = vmul.f32 %v765_v31, %v765_v31  ;;  %v772_v43 = vmul.f32 %v766_v6, %v766_v6  ;;  %v773_v44 = vmul.f32 %v767_v32, %v767_v32  ;;  %v762_v45 = vsub.f32 %v1322_v42, %v1394_v30  ;;  %v831_v32 = vld [vmem:[%s1504_s3] sm:$0xff] }
 0x22d   :  { %v807_v46 = vmul.f32 %v801_v33, %v801_v33  ;;  %v808_v47 = vmul.f32 %v802_v34, %v802_v34  ;;  %v809_v48 = vmul.f32 %v803_v39, %v803_v39  ;;  %v763_v50 = vsub.f32 %v1331_v3, %v1394_v30  ;;  %v835_v39 = vld [vmem:[%s1505_s4] sm:$0xff] }
 0x22e   :  { %v777_v51 = vadd.f32 %v772_v43, %v771_v41  ;;  %v778_v12 = vsel %vm361_vm12, %v773_v44, 0.0  ;;  %v764_v52 = vsub.f32 %v1407_v49, %v1394_v30  ;;  %v768_v53 = vmul.f32 %v762_v45, %v1308_v35  ;;  %v832_v43 = vld [vmem:[%s1504_s3 + $0x8] sm:$0xff] }
 0x22f   :  { %v813_v54 = vadd.f32 %v808_v47, %v807_v46  ;;  %v769_v55 = vmul.f32 %v763_v50, %v1310_v36  ;;  %v798_v57 = vsub.f32 %v1350_v60, %v1394_v30  ;;  %v799_v1 = vsub.f32 %v1354_v63, %v1394_v30  ;;  %v836_v47 = vld [vmem:[%s1505_s4 + $0x8] sm:$0xff] }
 0x230   :  { %v779_v59 = vadd.f32 %v778_v12, %v777_v51  ;;  %v770_v61 = vmul.f32 %v764_v52, %v1312_v37  ;;  %v774_v62 = vmul.f32 %v768_v53, %v768_v53  ;;  %v814_v2 = vsel %vm361_vm12, %v809_v48, 0.0 }
 0x231   :  { %v775_v4 = vmul.f32 %v769_v55, %v769_v55  ;;  %v800_v5 = vsub.f32 %v1422_v0, %v1394_v30  ;;  %v804_v7 = vmul.f32 %v798_v57, %v1308_v35  ;;  %v805_v9 = vmul.f32 %v799_v1, %v1310_v36 }
 0x232   :  { %780 = vadd.xlane.f32.xlu1 %v779_v59  ;;  %v776_v8 = vmul.f32 %v770_v61, %v770_v61  ;;  %v815_v14 = vadd.f32 %v814_v2, %v813_v54 }
 0x233   :  { %v782_v10 = vadd.f32 %v775_v4, %v774_v62  ;;  %v806_v11 = vmul.f32 %v800_v5, %v1312_v37  ;;  %v810_v13 = vmul.f32 %v804_v7, %v804_v7  ;;  %v811_v16 = vmul.f32 %v805_v9, %v805_v9 }
 0x234   :  { %v783_v15 = vsel %vm361_vm12, %v776_v8, 0.0 }
 0x235   :  { %v784_v17 = vadd.f32 %v783_v15, %v782_v10  ;;  %v812_v19 = vmul.f32 %v806_v11, %v806_v11  ;;  %v818_v20 = vadd.f32 %v811_v16, %v810_v13 }
 0x236   :  { %816 = vadd.xlane.f32.xlu1 %v815_v14 }
 0x237   :  { %785 = vadd.xlane.f32.xlu0 %v784_v17  ;;  %v819_v22 = vsel %vm361_vm12, %v812_v19, 0.0 }
 0x238   :  { %v820_v35 = vadd.f32 %v819_v22, %v818_v20 }
 0x23b   :  { %821 = vadd.xlane.f32.xlu0 %v820_v35 }
 0x2bf   :  { %v781_v23 = vpop.xlane.xlu1 %780 }
 0x2c3   :  { %v817_v24 = vpop.xlane.xlu1 %816 }
 0x2c4   :  { %v823_v36 = vadd.f32 %v817_v24, %v781_v23  ;;  %v786_v25 = vpop.xlane.xlu0 %785 }
 0x2c6   :  { %v825_v27 = vmul.f32 0.001953125, %v823_v36 }
 0x2c8   :  { %v827_v37 = vadd.f32 1e-05, %v825_v27  ;;  %v822_v28 = vpop.xlane.xlu0 %821 }
 0x2c9   :  { %v824_v29 = vadd.f32 %v822_v28, %v786_v25 }
 0x2ca   :  { %1064 = vrsqrt.f32 %v827_v37 }
 0x2cb   :  { %v826_v31 = vmul.f32 0.001953125, %v824_v29 }
 0x2cd   :  { %v828_v6 = vadd.f32 1e-05, %v826_v31 }
 0x2cf   :  { %1066 = vrsqrt.f32 %v828_v6 }
 0x2d4   :  { %v1065_v33 = vpop.eup %1064 }
 0x2d5   :  { %v833_v34 = vmul.f32 %v1065_v33, %v831_v32 }
 0x2d7   :  { %843 = vperm.xlu1 %1050, %v833_v34   ;;  %v837_v41 = vmul.f32 %v833_v34, %v1370_v18 }
 0x2d9   :  { %v1067_v44 = vpop.eup %1066  ;;  %v839_v45 = vsub.f32 %v835_v39, %v837_v41 }
 0x2da   :  { %v834_v46 = vmul.f32 %v1067_v44, %v832_v43 }
 0x2db   :  { %859 = vperm.xlu1 %1050, %v839_v45  }
 0x2dc   :  { %848 = vperm.xlu0 %1051, %v834_v46   ;;  %v838_v48 = vmul.f32 %v834_v46, %v1394_v30 }
 0x2de   :  { %v840_v50 = vsub.f32 %v836_v47, %v838_v48 }
 0x2e0   :  { %864 = vperm.xlu1 %1050, %v840_v50  }
 0x356   :  { %v844_v51 = vpop.permute.xlu1 %843 }
 0x357   :  { %v851_v18 = vmul.f32 %v844_v51, %v1314_v38  ;;  %v852_v12 = vmul.f32 %v844_v51, %v1318_v40  ;;  %v853_v52 = vmul.f32 %v844_v51, %v1375_v21  ;;  %v891_v53 = vmul.f32 %v844_v51, %v1342_v56 }
 0x358   :  { %v892_v54 = vmul.f32 %v844_v51, %v1346_v58  ;;  %v893_v55 = vmul.f32 %v1386_v26, %v844_v51 }
 0x35a   :  { %v860_v57 = vpop.permute.xlu1 %859 }
 0x35b   :  { %v867_v59 = vadd.f32 %v860_v57, %v851_v18  ;;  %v868_v61 = vadd.f32 %v860_v57, %v852_v12  ;;  %v869_v62 = vadd.f32 %v860_v57, %v853_v52  ;;  %v897_v30 = vadd.f32 %v891_v53, %v860_v57  ;;  %v849_v1 = vpop.permute.xlu0 %848 }
 0x35c   :  { %v898_v2 = vadd.f32 %v892_v54, %v860_v57  ;;  %v899_v4 = vadd.f32 %v893_v55, %v860_v57  ;;  %v854_v38 = vmul.f32 %v849_v1, %v1322_v42  ;;  %v855_v40 = vmul.f32 %v849_v1, %v1331_v3 }
 0x35d   :  { %v873_v5 = vmax.f32 %v867_v59, 0.0  ;;  %v874_v21 = vmax.f32 %v868_v61, 0.0  ;;  %v875_v7 = vmax.f32 %v869_v62, 0.0  ;;  %v903_v56 = vmax.f32 %v897_v30, 0.0 }
 0x35e   :  { %v904_v8 = vmax.f32 %v898_v2, 0.0  ;;  %v905_v58 = vmax.f32 %v899_v4, 0.0  ;;  %v856_v26 = vmul.f32 %v849_v1, %v1407_v49  ;;  %v894_v9 = vmul.f32 %v849_v1, %v1350_v60 }
 0x35f   :  { %879 = vst [vmem:[%s1503_s5] sm:$0xff] %v873_v5  ;;  %880 = vst [vmem:[%s1503_s5 + $0x8] sm:$0xff] %v874_v21  ;;  %v895_v42 = vmul.f32 %v849_v1, %v1354_v63  ;;  %v896_v3 = vmul.f32 %v1422_v0, %v849_v1  ;;  %v865_v60 = vpop.permute.xlu1 %864 }
 0x360   :  { %881 = vst.msk [vmem:[%s1503_s5 + $0x10] sm:$0xff] %vm361_vm12, %v875_v7  ;;  %993 = vst [vmem:[%s1503_s5 + $0x30] sm:$0xff] %v903_v56  ;;  %v870_v49 = vadd.f32 %v865_v60, %v854_v38  ;;  %v871_v10 = vadd.f32 %v865_v60, %v855_v40  ;;  %v872_v11 = vadd.f32 %v865_v60, %v856_v26 }
 0x361   :  { %994 = vst [vmem:[%s1503_s5 + $0x38] sm:$0xff] %v904_v8  ;;  %995 = vst.msk [vmem:[%s1503_s5 + $0x40] sm:$0xff] %vm361_vm12, %v905_v58  ;;  %v900_v13 = vadd.f32 %v894_v9, %v865_v60  ;;  %v901_v14 = vadd.f32 %v895_v42, %v865_v60  ;;  %v902_v15 = vadd.f32 %v896_v3, %v865_v60 }
 0x362   :  { %v876_v16 = vmax.f32 %v870_v49, 0.0  ;;  %v877_v63 = vmax.f32 %v871_v10, 0.0  ;;  %v878_v17 = vmax.f32 %v872_v11, 0.0 }
 0x363   :  { %v906_v0 = vmax.f32 %v900_v13, 0.0  ;;  %v907_v19 = vmax.f32 %v901_v14, 0.0  ;;  %v908_v20 = vmax.f32 %v902_v15, 0.0 }
 0x364   :  { %882 = vst [vmem:[%s1503_s5 + $0x18] sm:$0xff] %v876_v16  ;;  %883 = vst [vmem:[%s1503_s5 + $0x20] sm:$0xff] %v877_v63 }
 0x365   :  { %884 = vst.msk [vmem:[%s1503_s5 + $0x28] sm:$0xff] %vm361_vm12, %v878_v17  ;;  %996 = vst [vmem:[%s1503_s5 + $0x48] sm:$0xff] %v906_v0 }
 0x366   :  { %997 = vst [vmem:[%s1503_s5 + $0x50] sm:$0xff] %v907_v19  ;;  %998 = vst.msk [vmem:[%s1503_s5 + $0x58] sm:$0xff] %vm361_vm12, %v908_v20 }

</bundles_post_ra>
